<compile_context>
chip_gen: v7x
topology: tpu7x:2x2x1
jax: 0.10.0
libtpu: 0.0.40
codegen_flags: <defaults>
</compile_context>

<pallas_src>
import jax
import jax.numpy as jnp
from jax.experimental import pallas as pl
from jax.experimental.pallas import tpu as pltpu

BN_EPS = 1e-5  # nn.BatchNorm1d default
LANE = 128


def _round_up(n, m):
    return ((n + m - 1) // m) * m


def classifier_kernel(x_ref, w1_ref, params_ref, w2_ref, out_ref):
    # x:      (B, E)    f32
    # w1:     (E, Hp)   bf16   (pre-transposed, zero-padded to Hp = round_up(H, 128))
    # params: (8, W)    f32    rows: [b1, gamma, beta, b2, 0...]; W = max(Hp, Cp)
    # w2:     (Hp, Cp)  bf16   (pre-transposed, zero-padded)
    # out:    (B, Cp)   f32    (lane-dense store; caller slices back to C)
    Hp = w1_ref.shape[1]
    Cp = w2_ref.shape[1]
    B = x_ref.shape[0]

    # ---- Linear 1 on the MXU: bf16 operands, f32 accumulation ----
    x_bf16 = x_ref[...].astype(jnp.bfloat16)
    h = (jnp.dot(x_bf16, w1_ref[...], preferred_element_type=jnp.float32)
         + params_ref[0:1, :Hp])                                   # + b1

    # ---- BatchNorm1d (training-mode biased batch statistics), fused affine ----
    inv_b = 1.0 / B
    mean = jnp.sum(h, axis=0, keepdims=True) * inv_b               # (1, Hp)
    mean_sq = jnp.sum(h * h, axis=0, keepdims=True) * inv_b        # (1, Hp)
    var = jnp.maximum(mean_sq - mean * mean, 0.0)                  # clamp cancellation
    scale = params_ref[1:2, :Hp] * jax.lax.rsqrt(var + BN_EPS)     # gamma * rsqrt(var+eps)
    shift = params_ref[2:3, :Hp] - mean * scale                    # beta - mean*scale

    # Single (B, Hp) FMA + ReLU
    feat = jnp.maximum(h * scale + shift, 0.0)

    # ---- Linear 2 (classifier head) on the MXU ----
    out_ref[...] = (jnp.dot(feat.astype(jnp.bfloat16), w2_ref[...],
                            preferred_element_type=jnp.float32)
                    + params_ref[3:4, :Cp]).astype(out_ref.dtype)  # + b2


def pack_params(w1, b1, gamma, beta, w2, b2):
    """One-time packing: pad to lane-dense widths, cast weights to bf16,
    pack the four small vectors into a single (8, W) f32 slab."""
    E, H = w1.shape
    C = w2.shape[1]
    Hp = _round_up(H, LANE)
    Cp = _round_up(C, LANE)
    W = max(Hp, Cp)

    w1p = jnp.zeros((E, Hp), jnp.bfloat16).at[:, :H].set(w1.astype(jnp.bfloat16))
    w2p = jnp.zeros((Hp, Cp), jnp.bfloat16).at[:H, :C].set(w2.astype(jnp.bfloat16))

    slab = jnp.zeros((8, W), jnp.float32)
    slab = slab.at[0, :H].set(b1.reshape(-1))
    slab = slab.at[1, :H].set(gamma.reshape(-1))
    slab = slab.at[2, :H].set(beta.reshape(-1))
    slab = slab.at[3, :C].set(b2.reshape(-1))
    return w1p, slab, w2p, C


def classifier_forward(x, w1p, param_slab, w2p, num_classes):
    B = x.shape[0]
    Cp = w2p.shape[1]
    vmem = pl.BlockSpec(memory_space=pltpu.MemorySpace.VMEM)
    out = pl.pallas_call(
        classifier_kernel,
        out_shape=jax.ShapeDtypeStruct((B, Cp), jnp.float32),
        in_specs=[vmem, vmem, vmem, vmem],
        out_specs=vmem,
    )(x, w1p, param_slab, w2p)
    return out[:, :num_classes]


def init_params(key, dim_embedding, dim_hidden, num_classes):
    k1, k2, k3, k4 = jax.random.split(key, 4)
    # Deterministic, PyTorch-like uniform init for the linears; BN gamma=1, beta=0.
    lim1 = 1.0 / jnp.sqrt(dim_embedding)
    w1 = jax.random.uniform(k1, (dim_embedding, dim_hidden), jnp.float32, -lim1, lim1)
    b1 = jax.random.uniform(k2, (1, dim_hidden), jnp.float32, -lim1, lim1)
    gamma = jnp.ones((1, dim_hidden), jnp.float32)
    beta = jnp.zeros((1, dim_hidden), jnp.float32)
    lim2 = 1.0 / jnp.sqrt(dim_hidden)
    w2 = jax.random.uniform(k3, (dim_hidden, num_classes), jnp.float32, -lim2, lim2)
    b2 = jax.random.uniform(k4, (1, num_classes), jnp.float32, -lim2, lim2)
    return w1, b1, gamma, beta, w2, b2


def reference_forward_f32(x, w1, b1, gamma, beta, w2, b2):
    """Pure-f32 PyTorch-semantics reference (training-mode BatchNorm1d)."""
    h = x @ w1 + b1
    mean = jnp.mean(h, axis=0, keepdims=True)
    var = jnp.mean((h - mean) ** 2, axis=0, keepdims=True)
    feat = jnp.maximum((h - mean) / jnp.sqrt(var + BN_EPS) * gamma + beta, 0.0)
    return feat @ w2 + b2


def reference_forward_matched(x, w1, b1, gamma, beta, w2, b2):
    """Reference that mirrors the kernel math (bf16 MXU operands, f32 accumulation,
    single-pass variance) for a tight numerical check."""
    h = jnp.dot(x.astype(jnp.bfloat16), w1.astype(jnp.bfloat16),
                preferred_element_type=jnp.float32) + b1
    mean = jnp.mean(h, axis=0, keepdims=True)
    var = jnp.maximum(jnp.mean(h * h, axis=0, keepdims=True) - mean * mean, 0.0)
    scale = gamma * jax.lax.rsqrt(var + BN_EPS)
    shift = beta - mean * scale
    feat = jnp.maximum(h * scale + shift, 0.0)
    return jnp.dot(feat.astype(jnp.bfloat16), w2.astype(jnp.bfloat16),
                   preferred_element_type=jnp.float32) + b2


if __name__ == "__main__":
    # batch, dim_embedding, dim_hidden_classifier, num_target_class
    B, E, H, C = 8, 32, 64, 8
    key = jax.random.PRNGKey(0)
    kx, kp = jax.random.split(key)
    x = jax.random.normal(kx, (B, E), jnp.float32)
    raw = init_params(kp, E, H, C)

    # One-time parameter packing (padding + bf16 cast + bias/BN slab).
    w1p, slab, w2p, num_classes = pack_params(*raw)

    out = classifier_forward(x, w1p, slab, w2p, num_classes)
    out = jax.block_until_ready(out)
    assert out.shape == (B, C)

    # Tight check against a reference using the same bf16-in / f32-accumulate math.
    ref_matched = reference_forward_matched(x, *raw)
    assert jnp.allclose(out, ref_matched, atol=2e-3, rtol=2e-3)

    # Looser semantic check against the pure-f32 PyTorch-equivalent forward.
    ref_f32 = reference_forward_f32(x, *raw)
    assert jnp.allclose(out, ref_f32, atol=5e-2, rtol=5e-2)

    print("KERNEL_OK")
</pallas_src>

<mosaic_0001>
module attributes {stable_mosaic.version = 11 : i64} {
  func.func @classifier_kernel(%arg0: memref<8x32xf32, #tpu.memory_space<vmem>>, %arg1: memref<32x128xbf16, #tpu.memory_space<vmem>>, %arg2: memref<8x128xf32, #tpu.memory_space<vmem>>, %arg3: memref<128x128xbf16, #tpu.memory_space<vmem>>, %arg4: memref<8x128xf32, #tpu.memory_space<vmem>>) attributes {dimension_semantics = [], scalar_prefetch = 0 : i64, scratch_operands = 0 : i64, tpu.core_type = #tpu.core_type<tc>} {
    %c0 = arith.constant 0 : index
    %c0_0 = arith.constant 0 : index
    %0 = vector.load %arg0[%c0, %c0_0] : memref<8x32xf32, #tpu.memory_space<vmem>>, vector<8x32xf32>
    %1 = arith.truncf %0 : vector<8x32xf32> to vector<8x32xbf16>
    %c0_1 = arith.constant 0 : index
    %c0_2 = arith.constant 0 : index
    %2 = vector.load %arg1[%c0_1, %c0_2] : memref<32x128xbf16, #tpu.memory_space<vmem>>, vector<32x128xbf16>
    %cst = arith.constant dense<0.000000e+00> : vector<8x128xf32>
    %3 = tpu.matmul %1, %2, %cst {dimension_numbers = #tpu.dot_dimension_numbers<[1], [0], [0], [1], [0, 0, 1, 1], [], []>} : vector<8x32xbf16>, vector<32x128xbf16>, vector<8x128xf32> -> vector<8x128xf32>
    %c0_3 = arith.constant 0 : index
    %c0_4 = arith.constant 0 : index
    %4 = vector.load %arg2[%c0_3, %c0_4] : memref<8x128xf32, #tpu.memory_space<vmem>>, vector<1x128xf32>
    %5 = vector.broadcast %4 : vector<1x128xf32> to vector<8x128xf32>
    %6 = arith.addf %3, %5 : vector<8x128xf32>
    %cst_5 = arith.constant dense<0.000000e+00> : vector<128xf32>
    %7 = vector.multi_reduction <add>, %6, %cst_5 [0] : vector<8x128xf32> to vector<128xf32>
    %8 = vector.shape_cast %7 : vector<128xf32> to vector<1x128xf32>
    %cst_6 = arith.constant 1.250000e-01 : f32
    %9 = vector.broadcast %cst_6 : f32 to vector<1x128xf32>
    %10 = arith.mulf %8, %9 : vector<1x128xf32>
    %11 = arith.mulf %6, %6 : vector<8x128xf32>
    %cst_7 = arith.constant dense<0.000000e+00> : vector<128xf32>
    %12 = vector.multi_reduction <add>, %11, %cst_7 [0] : vector<8x128xf32> to vector<128xf32>
    %13 = vector.shape_cast %12 : vector<128xf32> to vector<1x128xf32>
    %cst_8 = arith.constant 1.250000e-01 : f32
    %14 = vector.broadcast %cst_8 : f32 to vector<1x128xf32>
    %15 = arith.mulf %13, %14 : vector<1x128xf32>
    %16 = arith.mulf %10, %10 : vector<1x128xf32>
    %17 = arith.subf %15, %16 : vector<1x128xf32>
    %cst_9 = arith.constant 0.000000e+00 : f32
    %18 = vector.broadcast %cst_9 : f32 to vector<1x128xf32>
    %19 = arith.maximumf %17, %18 : vector<1x128xf32>
    %c1 = arith.constant 1 : index
    %c0_10 = arith.constant 0 : index
    %20 = vector.load %arg2[%c1, %c0_10] : memref<8x128xf32, #tpu.memory_space<vmem>>, vector<1x128xf32>
    %cst_11 = arith.constant 9.99999974E-6 : f32
    %21 = vector.broadcast %cst_11 : f32 to vector<1x128xf32>
    %22 = arith.addf %19, %21 : vector<1x128xf32>
    %23 = math.rsqrt %22 : vector<1x128xf32>
    %24 = arith.mulf %20, %23 : vector<1x128xf32>
    %c2 = arith.constant 2 : index
    %c0_12 = arith.constant 0 : index
    %25 = vector.load %arg2[%c2, %c0_12] : memref<8x128xf32, #tpu.memory_space<vmem>>, vector<1x128xf32>
    %26 = arith.mulf %10, %24 : vector<1x128xf32>
    %27 = arith.subf %25, %26 : vector<1x128xf32>
    %28 = vector.broadcast %24 : vector<1x128xf32> to vector<8x128xf32>
    %29 = arith.mulf %6, %28 : vector<8x128xf32>
    %30 = vector.broadcast %27 : vector<1x128xf32> to vector<8x128xf32>
    %31 = arith.addf %29, %30 : vector<8x128xf32>
    %cst_13 = arith.constant 0.000000e+00 : f32
    %32 = vector.broadcast %cst_13 : f32 to vector<8x128xf32>
    %33 = arith.maximumf %31, %32 : vector<8x128xf32>
    %34 = arith.truncf %33 : vector<8x128xf32> to vector<8x128xbf16>
    %c0_14 = arith.constant 0 : index
    %c0_15 = arith.constant 0 : index
    %35 = vector.load %arg3[%c0_14, %c0_15] : memref<128x128xbf16, #tpu.memory_space<vmem>>, vector<128x128xbf16>
    %cst_16 = arith.constant dense<0.000000e+00> : vector<8x128xf32>
    %36 = tpu.matmul %34, %35, %cst_16 {dimension_numbers = #tpu.dot_dimension_numbers<[1], [0], [0], [1], [0, 0, 1, 1], [], []>} : vector<8x128xbf16>, vector<128x128xbf16>, vector<8x128xf32> -> vector<8x128xf32>
    %c3 = arith.constant 3 : index
    %c0_17 = arith.constant 0 : index
    %37 = vector.load %arg2[%c3, %c0_17] : memref<8x128xf32, #tpu.memory_space<vmem>>, vector<1x128xf32>
    %38 = vector.broadcast %37 : vector<1x128xf32> to vector<8x128xf32>
    %39 = arith.addf %36, %38 : vector<8x128xf32>
    %c0_18 = arith.constant 0 : index
    %c0_19 = arith.constant 0 : index
    %40 = vector.load %arg4[%c0_18, %c0_19] : memref<8x128xf32, #tpu.memory_space<vmem>>, vector<8x128xf32>
    tpu.vector_store %arg4[%c0_18, %c0_19], %39 {strides = array<i32>} : memref<8x128xf32, #tpu.memory_space<vmem>>, vector<8x128xf32>,
    return
  }
}

</mosaic_0001>

<bundles_post_ra>
// kernel: tpu_custom_call.1
= control target key start
LH: loop header
LB: loop body
LE: loop exit
PB: predicated region body
PF: predicated region fallthrough
CT: control target
= control target key end

     0   :  { %9 = vsyncpa [#allocation3], 0  ;;  %s593_s0 = inlined_call_operand.hbm [shape: f32[8,32], index: 0, kind: input, shape index: {}]   ;;  %s594_s1 = inlined_call_operand.hbm [shape: bf16[32,128], index: 1, kind: input, shape index: {}]   ;;  %s595_s2 = inlined_call_operand.hbm [shape: f32[8,128], index: 2, kind: input, shape index: {}]   ;;  %s596_s3 = inlined_call_operand.hbm [shape: bf16[128,128], index: 3, kind: input, shape index: {}]   ;;  %s597_s4 = inlined_call_operand.hbm [shape: f32[8,128], index: 4, kind: output, shape index: {}]  }
   0x1   :  { %10 = vsyncpa [#allocation6], 0 }
   0x2   :  { %11 = vsyncpa [#allocation9], 0 }
   0x3   :  { %12 = vsyncpa [#allocation4], 0  ;;  %s493_s15 = smov [#allocation5]   ;;  %s375_s19 = scalar_lea.hbm %s594_s1, 256 }
   0x4   :  { %s28_s16 = sshll.u32 %s493_s15, 4  ;;  %p376_p0 = scmp.ne.s32.totalorder %s594_s1, %s375_s19  ;;  %s29_s16 = int_to_ptr.vmem [resolvable:$true] %s28_s16 }
   0x5   :  { %p379_p1 = scmp.lt.u32.totalorder %s375_s19, %s594_s1 }
   0x7   :  { %p381_p2 = pnand %p379_p1, %p376_p0 }
   0x9   :  { %384 = shalt.err (!%p381_p2)
}
   0xa   :  { %s385_s24 = scalar_lea.vmem %s29_s16, 256  ;;  %p390_p4 = scmp.lt.s32.totalorder %s29_s16, %s29_s16 }
   0xb   :  { %p386_p3 = scmp.ne.s32.totalorder %s29_s16, %s385_s24  ;;  %p391_p5 = scmp.lt.s32.totalorder %s385_s24, %s385_s24 }
   0xd   :  { %p392_p6 = por %p391_p5, %p390_p4 }
   0xf   :  { %p393_p7 = pnand %p392_p6, %p386_p3 }
  0x11   :  { %396 = shalt.err (!%p393_p7)
}
  0x12   :  { %s494_s25 = smov 64   ;;  %s495_s26 = smov 4  }
  0x13   :  { %34 = dma.hbm_to_vmem [thread:$0]  %s594_s1, 256, %s29_s16, [#allocation6], %s494_s25, %s494_s25, %s495_s26  }
  0x14   :  { %s496_s29 = smov [#allocation2]   ;;  %s497_s5 = smov [#allocation7]  }
  0x15   :  { %s19_s30 = sshll.u32 %s496_s29, 4  ;;  %s41_s6 = sshll.u32 %s497_s5, 4  ;;  %s20_s30 = int_to_ptr.vmem [resolvable:$true] %s19_s30  ;;  %s42_s6 = int_to_ptr.vmem [resolvable:$true] %s41_s6 }
  0x16   :  { %s397_s9 = scalar_lea.hbm %s593_s0, 128 }
  0x17   :  { %p398_p8 = scmp.ne.s32.totalorder %s593_s0, %s397_s9  ;;  %p401_p9 = scmp.lt.u32.totalorder %s397_s9, %s593_s0 }
  0x19   :  { %p403_p10 = pnand %p401_p9, %p398_p8 }
  0x1b   :  { %406 = shalt.err (!%p403_p10)
}
  0x1c   :  { %s407_s1 = scalar_lea.vmem %s20_s30, 128  ;;  %p412_p12 = scmp.lt.s32.totalorder %s20_s30, %s20_s30 }
  0x1d   :  { %p408_p11 = scmp.ne.s32.totalorder %s20_s30, %s407_s1  ;;  %p413_p13 = scmp.lt.s32.totalorder %s407_s1, %s407_s1 }
  0x1f   :  { %p414_p0 = por %p413_p13, %p412_p12 }
  0x21   :  { %p415_p1 = pnand %p414_p0, %p408_p11 }
  0x23   :  { %418 = shalt.err (!%p415_p1)
}
  0x24   :  { %22 = dma.hbm_to_vmem [thread:$0]  %s593_s0, 128, %s20_s30, [#allocation3]  }
  0x25   :  { %s419_s18 = scalar_lea.hbm %s595_s2, 128 }
  0x26   :  { %p420_p2 = scmp.ne.s32.totalorder %s595_s2, %s419_s18  ;;  %p423_p3 = scmp.lt.u32.totalorder %s419_s18, %s595_s2 }
  0x28   :  { %p425_p4 = pnand %p423_p3, %p420_p2 }
  0x2a   :  { %428 = shalt.err (!%p425_p4)
}
  0x2b   :  { %s429_s23 = scalar_lea.vmem %s42_s6, 128  ;;  %p434_p6 = scmp.lt.s32.totalorder %s42_s6, %s42_s6 }
  0x2c   :  { %p430_p5 = scmp.ne.s32.totalorder %s42_s6, %s429_s23  ;;  %p435_p7 = scmp.lt.s32.totalorder %s429_s23, %s429_s23 }
  0x2e   :  { %p436_p8 = por %p435_p7, %p434_p6 }
  0x30   :  { %p437_p9 = pnand %p436_p8, %p430_p5 }
  0x32   :  { %440 = shalt.err (!%p437_p9)
}
  0x33   :  { %44 = dma.hbm_to_vmem [thread:$0]  %s595_s2, 128, %s42_s6, [#allocation6]  }
  0x34   :  { %s498_s27 = smov [#allocation8]   ;;  %s441_s5 = scalar_lea.hbm %s596_s3, 1024 }
  0x35   :  { %s50_s28 = sshll.u32 %s498_s27, 4  ;;  %p442_p10 = scmp.ne.s32.totalorder %s596_s3, %s441_s5  ;;  %s51_s28 = int_to_ptr.vmem [resolvable:$true] %s50_s28 }
  0x36   :  { %p445_p11 = scmp.lt.u32.totalorder %s441_s5, %s596_s3 }
  0x38   :  { %p447_p12 = pnand %p445_p11, %p442_p10 }
  0x3a   :  { %450 = shalt.err (!%p447_p12)
}
  0x3b   :  { %s451_s11 = scalar_lea.vmem %s51_s28, 1024  ;;  %p456_p0 = scmp.lt.s32.totalorder %s51_s28, %s51_s28 }
  0x3c   :  { %p452_p13 = scmp.ne.s32.totalorder %s51_s28, %s451_s11  ;;  %p457_p1 = scmp.lt.s32.totalorder %s451_s11, %s451_s11 }
  0x3e   :  { %p458_p2 = por %p457_p1, %p456_p0 }
  0x40   :  { %p459_p3 = pnand %p458_p2, %p452_p13 }
  0x42   :  { %462 = shalt.err (!%p459_p3)
}
  0x43   :  { %56 = dma.hbm_to_vmem [thread:$0]  %s596_s3, 1024, %s51_s28, [#allocation9], %s494_s25, %s494_s25, %s495_s26  }
  0x44   :  { %485 = dma.done.wait [#allocation3], 128  }
  0x45   :  { %486 = vsyncadd [#allocation3], 4294967168 }
  0x46   :  { %487 = dma.done.wait [#allocation6], 384  }
  0x47   :  { %488 = vsyncadd [#allocation6], 4294966912 }
  0x48   :  { %489 = dma.done.wait [#allocation9], 1024  }
  0x49   :  { %490 = vsyncadd [#allocation9], 4294966272  ;;  %v499_v0 = vmov 0.0   ;;  %vm500_vm0 = vmmov 0   ;;  %v363_v1 = vld [vmem:[#allocation5] sm:$0xff]   ;;  %v364_v2 = vld [vmem:[#allocation5 + $0x8] sm:$0xff]   ;;  %v162_v38 = vlaneseq }
  0x4a   :  { %326 = vmatprep.subr.bf16.mxu0 %v499_v0  ;;  %330 = vmatprep.mubr.msk.bf16.mxu0 %vm500_vm0, %v499_v0  ;;  %v70_v3 = vld [vmem:[#allocation2] sm:$0xff]  ;;  %vm93_vm1 = vcmask 261120   ;;  %v366_v6 = vld [vmem:[#allocation8 + $0x8] sm:$0xff]   ;;  %v367_v7 = vld [vmem:[#allocation8 + $0x10] sm:$0xff]   ;;  %s501_s3 = smov [#allocation10]  }
  0x4b   :  { %334 = vmatprep.subr.bf16.mxu1 %v499_v0  ;;  %350 = vmatprep.mubr.msk.bf16.mxu1 %vm500_vm0, %v499_v0  ;;  %v71_v4 = vpack.c.bf16 %v70_v3, %v70_v3  ;;  %v365_v5 = vld [vmem:[#allocation8] sm:$0xff]   ;;  %v368_v8 = vld [vmem:[#allocation8 + $0x18] sm:$0xff]   ;;  %v370_v10 = vld [vmem:[#allocation8 + $0x28] sm:$0xff]   ;;  %v163_v39 = vshrl.u32 %v162_v38, 7  ;;  %s290_s25 = sshll.u32 %s501_s3, 4  ;;  %s291_s25 = int_to_ptr.vmem [resolvable:$true] %s290_s25 }
  0x4c   :  { %327 = vmatpush3.bf16.msra.mxu0 %v363_v1  ;;  %335 = vmatpush3.bf16.msra.mxu1 %v365_v5  ;;  %v369_v9 = vld [vmem:[#allocation8 + $0x20] sm:$0xff]   ;;  %v371_v11 = vld [vmem:[#allocation8 + $0x30] sm:$0xff]   ;;  %v372_v12 = vld [vmem:[#allocation8 + $0x38] sm:$0xff]   ;;  %s463_s26 = scalar_lea.vmem %s291_s25, 128  ;;  %p468_p5 = scmp.lt.s32.totalorder %s291_s25, %s291_s25 }
  0x4d   :  { %328 = vmatprep.subr.bf16.mxu0 %v499_v0  ;;  %336 = vmatprep.subr.bf16.mxu1 %v499_v0  ;;  %v301_v13 = vld [vmem:[#allocation7] ss:$0 sm:$0xff]  ;;  %v155_v40 = vld [vmem:[#allocation7 + $0x1] sm:$0x1]  ;;  %v164_v41 = vsub.s32 0, %v163_v39  ;;  %p464_p4 = scmp.ne.s32.totalorder %s291_s25, %s463_s26  ;;  %p469_p6 = scmp.lt.s32.totalorder %s463_s26, %s463_s26 }
  0x4e   :  { %v159_v44 = vld [vmem:[#allocation7 + $0x2] sm:$0x1]  ;;  %v305_v53 = vld [vmem:[#allocation7 + $0x3] ss:$0 sm:$0xff] }
  0x4f   :  { %p470_p7 = por %p469_p6, %p468_p5 }
  0x50   :  { %329 = vmatpush3.bf16.msra.mxu0 %v364_v2  ;;  %337 = vmatpush3.bf16.msra.mxu1 %v366_v6 }
  0x51   :  { %338 = vmatprep.subr.bf16.mxu1 %v499_v0  ;;  %p471_p8 = pnand %p470_p7, %p464_p4 }
  0x53   :  { %331 = vmatmul.mubr.msk.bf16.vlgmr.msra.gmra.mrb[0].mxu0 %vm93_vm1, %v71_v4 }
  0x54   :  { %339 = vmatpush3.bf16.msra.mxu1 %v367_v7 }
  0x55   :  { %340 = vmatprep.subr.bf16.mxu1 %v499_v0 }
  0x58   :  { %341 = vmatpush3.bf16.msra.mxu1 %v368_v8 }
  0x59   :  { %342 = vmatprep.subr.bf16.mxu1 %v499_v0 }
  0x5c   :  { %343 = vmatpush3.bf16.msra.mxu1 %v369_v9 }
  0x5d   :  { %344 = vmatprep.subr.bf16.mxu1 %v499_v0 }
  0x60   :  { %345 = vmatpush3.bf16.msra.mxu1 %v370_v10 }
  0x61   :  { %346 = vmatprep.subr.bf16.mxu1 %v499_v0 }
  0x64   :  { %347 = vmatpush3.bf16.msra.mxu1 %v371_v11 }
  0x65   :  { %348 = vmatprep.subr.bf16.mxu1 %v499_v0 }
  0x68   :  { %349 = vmatpush3.bf16.msra.mxu1 %v372_v12 }
 0x126   :  { %v131_v14 = vpop.f32.mrb[0].mxu0 }
 0x127   :  { %v132_v15 = vadd.f32 %v301_v13, %v131_v14  ;;  %v332_v16 = vpop.f32.mrb[1].mxu0 }
 0x128   :  { %v134_v17 = vpop.f32.mrb[2].mxu0 }
 0x129   :  { %v137_v18 = vrot.slane %v132_v15, 4  ;;  %v144_v19 = vmul.f32 %v132_v15, %v132_v15  ;;  %v333_v20 = vpop.f32.mrb[3].mxu0 }
 0x12b   :  { %v138_v21 = vadd.f32 %v137_v18, %v132_v15  ;;  %v145_v22 = vrot.slane %v144_v19, 4 }
 0x12d   :  { %v139_v23 = vrot.slane %v138_v21, 2  ;;  %v146_v24 = vadd.f32 %v145_v22, %v144_v19 }
 0x12f   :  { %v140_v25 = vadd.f32 %v139_v23, %v138_v21  ;;  %v147_v26 = vrot.slane %v146_v24, 2 }
 0x131   :  { %v141_v27 = vrot.slane %v140_v25, 1  ;;  %v148_v28 = vadd.f32 %v147_v26, %v146_v24 }
 0x133   :  { %v142_v29 = vadd.f32 %v141_v27, %v140_v25  ;;  %v149_v30 = vrot.slane %v148_v28, 1 }
 0x135   :  { %v150_v31 = vadd.f32 %v149_v30, %v148_v28  ;;  %v143_v32 = vmul.f32 0.125, %v142_v29 }
 0x137   :  { %v151_v33 = vmul.f32 0.125, %v150_v31  ;;  %v152_v34 = vmul.f32 %v143_v32, %v143_v32 }
 0x139   :  { %v153_v35 = vsub.f32 %v151_v33, %v152_v34 }
 0x13b   :  { %v154_v36 = vmax.f32 %v153_v35, 0.0 }
 0x13d   :  { %v156_v37 = vadd.f32 1e-05, %v154_v36 }
 0x13f   :  { %373 = vrsqrt.f32 %v156_v37 }
 0x149   :  { %v374_v42 = vpop.eup %373 }
 0x14a   :  { %v158_v43 = vmul.f32 %v374_v42, %v155_v40 }
 0x14c   :  { %v160_v45 = vmul.f32 %v158_v43, %v143_v32  ;;  %v165_v46 = vrot.slane %v158_v43, %v164_v41 }
 0x14e   :  { %v161_v47 = vsub.f32 %v159_v44, %v160_v45  ;;  %v166_v48 = vmul.f32 %v165_v46, %v132_v15 }
 0x150   :  { %v170_v49 = vrot.slane %v161_v47, %v164_v41 }
 0x152   :  { %v171_v50 = vadd.f32 %v170_v49, %v166_v48 }
 0x154   :  { %v172_v51 = vmax.f32 %v171_v50, 0.0 }
 0x156   :  { %v173_v52 = vpack.c.bf16 %v172_v51, %v172_v51 }
 0x158   :  { %351 = vmatmul.mubr.bf16.vlgmr.msra.gmra.mrb[0].mxu1 %v173_v52 }
 0x22b   :  { %v277_v54 = vpop.f32.mrb[0].mxu1 }
 0x22c   :  { %v278_v55 = vadd.f32 %v305_v53, %v277_v54  ;;  %v352_v56 = vpop.f32.mrb[1].mxu1 }
 0x22d   :  { %v280_v57 = vpop.f32.mrb[2].mxu1 }
 0x22e   :  { %283 = vst [vmem:[#allocation10] sm:$0xff] %v278_v55  ;;  %v353_v58 = vpop.f32.mrb[3].mxu1 }
 0x22f   :  { %474 = shalt.err (!%p471_p8)
}
 0x230   :  { %s475_s1 = scalar_lea.hbm %s597_s4, 128 }
 0x231   :  { %p476_p9 = scmp.ne.s32.totalorder %s597_s4, %s475_s1  ;;  %p479_p10 = scmp.lt.u32.totalorder %s475_s1, %s597_s4 }
 0x233   :  { %p481_p11 = pnand %p479_p10, %p476_p9 }
 0x235   :  { %484 = shalt.err (!%p481_p11)
}
 0x236   :  { %293 = dma.vmem_to_hbm [thread:$0]  %s291_s25, 128, %s597_s4, [#allocation4]  }
 0x237   :  { %491 = dma.done.wait [#allocation4], 128  }
 0x238   :  { %492 = vsyncadd [#allocation4], 4294967168 }
 0x239   :  { %297 = vsyncpa [#allocation3], 1 }
 0x23a   :  { %298 = vsyncpa [#allocation6], 1 }
 0x23b   :  { %299 = vsyncpa [#allocation9], 1 }
 0x23c   :  { %300 = vsyncpa [#allocation4], 1 }

</bundles_post_ra>
